<compile_context>
chip_gen: v6e
topology: v6e:2x2x1
jax: 0.10.0
libtpu: 0.0.40
codegen_flags: <defaults>
</compile_context>

<pallas_src>
import functools

import jax
import jax.numpy as jnp
import numpy as np
from jax.experimental import pallas as pl
from jax.experimental.pallas import tpu as pltpu


def _round_up(x: int, m: int) -> int:
    return ((x + m - 1) // m) * m


def _cdiv(a: int, b: int) -> int:
    return -(-a // b)


def _pos_enc_kernel(inv_freq_ref, o_ref, *, tile_s: int):
    """Fill one (tile_s, ed_pad) row-tile of the positional-encoding table."""
    ts, _ = o_ref.shape
    row0 = pl.program_id(0) * tile_s                       # scalar row offset of this tile

    # (ts, 1) position column: iota/add/convert touch only ts elements (ts/8 vregs),
    # not the full (ts, ed) tile.
    pos = (row0 + jax.lax.broadcasted_iota(jnp.int32, (ts, 1), 0)).astype(jnp.float32)

    # (ts,1) x (1,ed) broadcast multiply; single transcendental (sin) per element.
    o_ref[...] = jnp.sin(pos * inv_freq_ref[...])


def positional_encoding(
    seq_len: int,
    embedding_dim: int,
    d_model: int,
    *,
    keep_padding: bool = False,
    vmem_buffer_budget_bytes: int = 12 * 1024 * 1024,
    megacore_split_bytes: int = 2 * 1024 * 1024,
) -> jax.Array:
    """Pallas implementation of Positional_Encoding(d_model).forward(seq_len, embedding_dim).

    If keep_padding=True, returns the lane-dense (seq_pad, ed_pad) f32 table
    (padded region holds real sin values) and skips the post-kernel slice copy.
    """
    assert seq_len >= 1 and embedding_dim >= 1 and d_model >= 1
    # Positions are built in int32 and converted to f32 (exact only up to 2^24).
    assert seq_len < (1 << 24), "seq_len too large for exact f32 positions"

    # Lane-dense, sublane-aligned padded table shape.
    ed_pad = _round_up(embedding_dim, 128)
    seq8 = _round_up(seq_len, 8)
    bytes_per_row = 4 * ed_pad

    # Choose the number of grid steps first, then the tile, so over-padding is
    # at most 8*n_steps - 1 rows (instead of rounding seq up to a tile multiple).
    rows_fit = max(8, (vmem_buffer_budget_bytes // bytes_per_row) // 8 * 8)
    n_steps = _cdiv(seq8, rows_fit)
    # Give v7x's two TensorCores something to split for non-trivial tables.
    if n_steps == 1 and seq8 >= 16 and seq8 * bytes_per_row >= megacore_split_bytes:
        n_steps = 2
    if n_steps > 1 and (n_steps % 2 == 1):
        n_steps += 1
    tile_s = _round_up(_cdiv(seq8, n_steps), 8)
    seq_pad = n_steps * tile_s
    grid = (n_steps,)

    # Per-column inverse frequency, computed once on host in float64 then cast.
    inv_freq = np.power(
        10000.0, -2.0 * np.arange(ed_pad, dtype=np.float64) / float(d_model)
    ).astype(np.float32).reshape(1, ed_pad)
    inv_freq = jnp.asarray(inv_freq)

    kernel = functools.partial(_pos_enc_kernel, tile_s=tile_s)

    cost = pl.CostEstimate(
        flops=2 * seq_pad * ed_pad,
        transcendentals=seq_pad * ed_pad,
        bytes_accessed=4 * seq_pad * ed_pad + 4 * ed_pad,
    )

    out = pl.pallas_call(
        kernel,
        out_shape=jax.ShapeDtypeStruct((seq_pad, ed_pad), jnp.float32),
        grid_spec=pltpu.PrefetchScalarGridSpec(
            num_scalar_prefetch=0,
            grid=grid,
            in_specs=[pl.BlockSpec((1, ed_pad), lambda s: (0, 0))],
            out_specs=pl.BlockSpec((tile_s, ed_pad), lambda s: (s, 0)),
        ),
        compiler_params=pltpu.CompilerParams(
            dimension_semantics=("parallel",),
            vmem_limit_bytes=48 * 1024 * 1024,
        ),
        cost_estimate=cost,
    )(inv_freq)

    if keep_padding:
        return out                          # (seq_pad, ed_pad), lane-dense, no extra copy
    if seq_pad != seq_len or ed_pad != embedding_dim:
        out = out[:seq_len, :embedding_dim]
    return out


def _reference(seq_len: int, embedding_dim: int, d_model: int) -> np.ndarray:
    pos = np.arange(seq_len, dtype=np.float64)[:, None]
    i = np.arange(embedding_dim, dtype=np.float64)[None, :]
    return np.sin(pos / np.power(10000.0, 2.0 * i / float(d_model)))


if __name__ == "__main__":
    # Small shapes consistent with the module's forward signature.
    seq_len, embedding_dim, d_model = 16, 32, 32

    # (No tensor inputs; PRNGKey only kept for harness convention.)
    _ = jax.random.PRNGKey(0)

    out = jax.block_until_ready(positional_encoding(seq_len, embedding_dim, d_model))
    np.testing.assert_allclose(
        np.asarray(out, dtype=np.float64), _reference(seq_len, embedding_dim, d_model),
        atol=1e-5, rtol=1e-5,
    )

    # Non-multiple-of-8 seq_len / non-multiple-of-128 embedding_dim (pad + slice).
    out2 = jax.block_until_ready(positional_encoding(13, 20, d_model))
    np.testing.assert_allclose(
        np.asarray(out2, dtype=np.float64), _reference(13, 20, d_model),
        atol=1e-5, rtol=1e-5,
    )

    # Force a multi-step grid at a still-small shape by shrinking the per-buffer
    # budget: exercises the cdiv-based tiling, partial-last-tile padding and slice.
    out3 = jax.block_until_ready(
        positional_encoding(200, 96, 64, vmem_buffer_budget_bytes=64 * 1024)
    )
    np.testing.assert_allclose(
        np.asarray(out3, dtype=np.float64), _reference(200, 96, 64),
        atol=1e-4, rtol=1e-4,
    )

    # keep_padding path: lane-dense padded table, valid region matches reference.
    out4 = jax.block_until_ready(positional_encoding(13, 20, d_model, keep_padding=True))
    assert out4.shape == (16, 128)
    np.testing.assert_allclose(
        np.asarray(out4[:13, :20], dtype=np.float64), _reference(13, 20, d_model),
        atol=1e-5, rtol=1e-5,
    )

    print("KERNEL_OK")
</pallas_src>

<mosaic_0001>
module attributes {stable_mosaic.version = 11 : i64} {
  func.func @_pos_enc_kernel(%arg0: i32, %arg1: memref<1x128xf32, #tpu.memory_space<vmem>>, %arg2: memref<16x128xf32, #tpu.memory_space<vmem>>) attributes {dimension_semantics = [#tpu.dimension_semantics<parallel>], iteration_bounds = array<i64: 1>, scalar_prefetch = 0 : i64, scratch_operands = 0 : i64, tpu.core_type = #tpu.core_type<tc>, window_params = [{pipeline_mode = #tpu.pipeline_mode<synchronous>, transform_indices = @transform_0, window_bounds = array<i64: 1, 128>}, {transform_indices = @transform_1, window_bounds = array<i64: 16, 128>}]} {
    %c16_i32 = arith.constant 16 : i32
    %0 = arith.muli %arg0, %c16_i32 : i32
    %1 = tpu.iota {dimensions = array<i32: 0>} : vector<16x1xi32>
    %2 = vector.broadcast %0 : i32 to vector<16x1xi32>
    %3 = arith.addi %2, %1 : vector<16x1xi32>
    %4 = arith.sitofp %3 : vector<16x1xi32> to vector<16x1xf32>
    %c0 = arith.constant 0 : index
    %c0_0 = arith.constant 0 : index
    %5 = vector.load %arg1[%c0, %c0_0] : memref<1x128xf32, #tpu.memory_space<vmem>>, vector<1x128xf32>
    %6 = vector.broadcast %4 : vector<16x1xf32> to vector<16x128xf32>
    %7 = vector.broadcast %5 : vector<1x128xf32> to vector<16x128xf32>
    %8 = arith.mulf %6, %7 : vector<16x128xf32>
    %9 = math.sin %8 : vector<16x128xf32>
    %c0_1 = arith.constant 0 : index
    %c0_2 = arith.constant 0 : index
    %10 = vector.load %arg2[%c0_1, %c0_2] : memref<16x128xf32, #tpu.memory_space<vmem>>, vector<16x128xf32>
    tpu.vector_store %arg2[%c0_1, %c0_2], %9 {strides = array<i32>} : memref<16x128xf32, #tpu.memory_space<vmem>>, vector<16x128xf32>,
    return
  }
  func.func @transform_0(%arg0: i32) -> (i32, i32) {
    %c0_i32 = arith.constant 0 : i32
    %c0_i32_0 = arith.constant 0 : i32
    %c0_i32_1 = arith.constant 0 : i32
    return %c0_i32, %c0_i32_0 : i32, i32
  }
  func.func @transform_1(%arg0: i32) -> (i32, i32) {
    %c0_i32 = arith.constant 0 : i32
    %c0_i32_0 = arith.constant 0 : i32
    return %arg0, %c0_i32 : i32, i32
  }
}

</mosaic_0001>

<bundles_post_ra>
// kernel: tpu_custom_call.1
= control target key start
LH: loop header
LB: loop body
LE: loop exit
PB: predicated region body
PF: predicated region fallthrough
CT: control target
= control target key end

     0   :  { %6 = vsyncpa [#allocation3], 0  ;;  %s449_s0 = inlined_call_operand.hbm [shape: f32[1,128], index: 0, kind: input, shape index: {}]   ;;  %s450_s1 = inlined_call_operand.hbm [shape: f32[16,128], index: 1, kind: output, shape index: {}]  }
   0x1   :  { %7 = vsyncpa [#allocation4], 0  ;;  %s345_s6 = smov [#allocation2]  }
   0x2   :  { %s14_s7 = sshll.u32 %s345_s6, 4  ;;  %s15_s7 = int_to_ptr.vmem [resolvable:$true] %s14_s7 }
   0x3   :  { %s309_s8 = scalar_lea.vmem %s15_s7, 16  ;;  %s313_s9 = scalar_lea.vmem %s15_s7, 32 }
   0x4   :  { %p310_p0 = scmp.ne.s32.totalorder %s15_s7, %s309_s8  ;;  %p314_p1 = scmp.lt.s32.totalorder %s15_s7, %s15_s7 }
   0x5   :  { %p315_p2 = scmp.lt.s32.totalorder %s313_s9, %s309_s8 }
   0x7   :  { %p316_p3 = por %p315_p2, %p314_p1 }
   0x9   :  { %p317_p4 = pnand %p316_p3, %p310_p0 }
   0xb   :  { %320 = shalt.err (!%p317_p4)
}
   0xc   :  { %17 = dma.hbm_to_vmem [thread:$0]  %s449_s0, 16, %s15_s7, [#allocation3]  }
   0xd   :  { %341 = dma.done.wait [#allocation3], 16  }
   0xe   :  { %342 = vsyncadd [#allocation3], 4294967280  ;;  %v22_v0 = vlaneseq  ;;  %v266_v5 = vld [vmem:[#allocation2] ss:$0 sm:$0xff]  ;;  %v346_v30 = vmov 683565275  }
   0xf   :  { %v347_v32 = vmov 2475754826   ;;  %v348_v34 = vmov 2131351028   ;;  %v349_v36 = vmov 2102212464  }
  0x10   :  { %v23_v1 = vshrl.u32 %v22_v0, 7  ;;  %v350_v38 = vmov 920167782   ;;  %v351_v46 = vmov 1326507024   ;;  %s352_s0 = smov [#allocation5]  }
  0x11   :  { %s254_s12 = sshll.u32 %s352_s0, 4  ;;  %s255_s12 = int_to_ptr.vmem [resolvable:$true] %s254_s12 }
  0x12   :  { %v28_v2 = vcvt.s32.f32 %v23_v1  ;;  %v24_v3 = vadd.s32 8, %v23_v1  ;;  %s321_s13 = scalar_lea.vmem %s255_s12, 256  ;;  %p326_p6 = scmp.lt.s32.totalorder %s255_s12, %s255_s12 }
  0x13   :  { %p322_p5 = scmp.ne.s32.totalorder %s255_s12, %s321_s13  ;;  %p327_p7 = scmp.lt.s32.totalorder %s321_s13, %s321_s13 }
  0x14   :  { %v29_v4 = vcvt.s32.f32 %v24_v3  ;;  %v368_v6 = vmul.f32 %v266_v5, %v28_v2 }
  0x15   :  { %p328_p8 = por %p327_p7, %p326_p6 }
  0x16   :  { %v370_v7 = vmul.f32 %v266_v5, %v29_v4  ;;  %v39_v8 = vand.u32 2147483647, %v368_v6  ;;  %v42_v9 = vand.u32 2139095040, %v368_v6  ;;  %vm41_vm14 = vcmp.lt.s32.totalorder %v368_v6, 0 }
  0x17   :  { %p329_p9 = pnand %p328_p8, %p322_p5 }
  0x18   :  { %v143_v10 = vand.u32 2147483647, %v370_v7  ;;  %v146_v11 = vand.u32 2139095040, %v370_v7  ;;  %v43_v12 = vshrl.u32 %v42_v9, 23  ;;  %v46_v13 = vand.u32 8388607, %v39_v8 }
  0x19   :  { %vm431_vm15 = vcmp.le.f32.partialorder %v39_v8, 0.7853982 }
  0x1a   :  { %v147_v14 = vshrl.u32 %v146_v11, 23  ;;  %v150_v15 = vand.u32 8388607, %v143_v10  ;;  %v267_v16 = vadd.s32 4294967169, %v43_v12  ;;  %v47_v19 = vor.u32 8388608, %v46_v13 }
  0x1c   :  { %v271_v17 = vadd.s32 4294967169, %v147_v14  ;;  %v49_v18 = vadd.s32 1, %v267_v16  ;;  %v151_v20 = vor.u32 8388608, %v150_v15  ;;  %v380_v26 = vshll.u32 %v47_v19, 8 }
  0x1e   :  { %v153_v21 = vadd.s32 1, %v271_v17  ;;  %vm50_vm0 = vcmp.gt.s32.totalorder %v49_v18, 0  ;;  %v382_v28 = vshll.u32 %v151_v20, 8 }
  0x1f   :  { %v51_v22 = vsel %vm50_vm0, %v49_v18, 0  ;;  %vm145_vm0 = vcmp.lt.s32.totalorder %v370_v7, 0 }
  0x20   :  { %vm154_vm1 = vcmp.gt.s32.totalorder %v153_v21, 0  ;;  %v52_v23 = vshrl.u32 %v51_v22, 5  ;;  %v53_v24 = vand.u32 31, %v51_v22 }
  0x21   :  { %v155_v25 = vsel %vm154_vm1, %v153_v21, 0  ;;  %vm144_vm1 = vcmp.le.f32.partialorder %v143_v10, 0.7853982 }
  0x22   :  { %v157_v27 = vand.u32 31, %v155_v25  ;;  %v54_v29 = vsub.s32 32, %v53_v24  ;;  %v56_v31 = vshll.u32 %v346_v30, %v53_v24  ;;  %v59_v33 = vshll.u32 %v347_v32, %v53_v24 }
  0x23   :  { %v62_v35 = vshll.u32 %v348_v34, %v53_v24  ;;  %v65_v37 = vshll.u32 %v349_v36, %v53_v24  ;;  %v68_v39 = vshll.u32 %v350_v38, %v53_v24  ;;  %vm71_vm2 = vcmp.lt.s32.totalorder %v52_v23, 1 }
  0x24   :  { %v384_v40 = vshrl.u32 %v155_v25, 5  ;;  %v55_v41 = vshrl.u32 %v346_v30, %v54_v29  ;;  %v57_v42 = vshrl.u32 %v347_v32, %v54_v29  ;;  %v60_v43 = vshrl.u32 %v348_v34, %v54_v29 }
  0x25   :  { %v63_v44 = vshrl.u32 %v349_v36, %v54_v29  ;;  %v66_v45 = vshrl.u32 %v350_v38, %v54_v29  ;;  %v69_v47 = vshrl.u32 %v351_v46, %v54_v29  ;;  %vm72_vm3 = vcmp.lt.s32.totalorder %v52_v23, 2 }
  0x26   :  { %vm74_vm4 = vcmp.lt.s32.totalorder %v52_v23, 4  ;;  %v58_v48 = vor.u32 %v57_v42, %v56_v31  ;;  %v61_v49 = vor.u32 %v60_v43, %v59_v33  ;;  %v158_v51 = vsub.s32 32, %v157_v27 }
  0x27   :  { %v64_v50 = vor.u32 %v63_v44, %v62_v35  ;;  %v67_v52 = vor.u32 %v66_v45, %v65_v37  ;;  %v70_v53 = vor.u32 %v69_v47, %v68_v39  ;;  %vm73_vm5 = vcmp.lt.s32.totalorder %v52_v23, 3 }
  0x28   :  { %v160_v54 = vshll.u32 %v346_v30, %v157_v27  ;;  %v75_v55 = vsel %vm71_vm2, %v55_v41, %v58_v48  ;;  %v79_v57 = vsel %vm71_vm2, %v58_v48, %v61_v49  ;;  %v163_v62 = vshll.u32 %v347_v32, %v157_v27 }
  0x29   :  { %v76_v56 = vsel %vm74_vm4, %v64_v50, 2102212464  ;;  %v83_v58 = vsel %vm71_vm2, %v61_v49, %v64_v50  ;;  %v80_v60 = vsel %vm74_vm4, %v67_v52, 920167782  ;;  %v84_v61 = vsel %vm74_vm4, %v70_v53, 1326507024 }
  0x2a   :  { %v77_v59 = vsel %vm73_vm5, %v61_v49, %v76_v56  ;;  %v81_v63 = vsel %vm73_vm5, %v64_v50, %v80_v60  ;;  %v85_v0 = vsel %vm73_vm5, %v67_v52, %v84_v61  ;;  %v159_v1 = vshrl.u32 %v346_v30, %v158_v51 }
  0x2b   :  { %v161_v2 = vshrl.u32 %v347_v32, %v158_v51  ;;  %v78_v3 = vsel %vm72_vm3, %v75_v55, %v77_v59  ;;  %v82_v4 = vsel %vm72_vm3, %v79_v57, %v81_v63  ;;  %v86_v5 = vsel %vm72_vm3, %v83_v58, %v85_v0 }
  0x2c   :  { %v164_v9 = vshrl.u32 %v348_v34, %v158_v51  ;;  %v393_v11 = vmul.u32.u64.low %v380_v26, %v86_v5  ;;  %v394_v12 = vmul.u32.u64.high %v380_v26, %v86_v5, %v393_v11  ;;  %v166_v17 = vshll.u32 %v348_v34, %v157_v27 }
  0x2d   :  { %v397_v13 = vmul.u32.u64.low %v380_v26, %v82_v4  ;;  %v398_v14 = vmul.u32.u64.high %v380_v26, %v82_v4, %v397_v13  ;;  %v162_v15 = vor.u32 %v161_v2, %v160_v54  ;;  %v167_v18 = vshrl.u32 %v349_v36, %v158_v51 }
  0x2e   :  { %v165_v16 = vor.u32 %v164_v9, %v163_v62  ;;  %v169_v19 = vshll.u32 %v349_v36, %v157_v27  ;;  %v170_v20 = vshrl.u32 %v350_v38, %v158_v51  ;;  %v172_v21 = vshll.u32 %v350_v38, %v157_v27 }
  0x2f   :  { %v173_v22 = vshrl.u32 %v351_v46, %v158_v51  ;;  %v94_v23 = vmul.u32 %v380_v26, %v78_v3  ;;  %v168_v24 = vor.u32 %v167_v18, %v166_v17  ;;  %vm175_vm6 = vcmp.lt.s32.totalorder %v384_v40, 1 }
  0x30   :  { %vm176_vm7 = vcmp.lt.s32.totalorder %v384_v40, 2  ;;  %vm96_vm8 = vc.u32 %v394_v12, %v397_v13  ;;  %v97_v25 = vadd.s32 1, %v398_v14  ;;  %v171_v29 = vor.u32 %v170_v20, %v169_v19 }
  0x31   :  { %vm177_vm9 = vcmp.lt.s32.totalorder %v384_v40, 3  ;;  %v174_v30 = vor.u32 %v173_v22, %v172_v21  ;;  %vm178_vm10 = vcmp.lt.s32.totalorder %v384_v40, 4  ;;  %v179_v31 = vsel %vm175_vm6, %v159_v1, %v162_v15 }
  0x32   :  { %v183_v27 = vsel %vm175_vm6, %v162_v15, %v165_v16  ;;  %v98_v32 = vsel %vm96_vm8, %v97_v25, %v398_v14  ;;  %v180_v26 = vsel %vm178_vm10, %v168_v24, 2102212464  ;;  %v184_v33 = vsel %vm178_vm10, %v171_v29, 920167782 }
  0x33   :  { %v187_v34 = vsel %vm175_vm6, %v165_v16, %v168_v24  ;;  %v99_v35 = vadd.s32 %v98_v32, %v94_v23  ;;  %v181_v36 = vsel %vm177_vm9, %v165_v16, %v180_v26  ;;  %v185_v37 = vsel %vm177_vm9, %v168_v24, %v184_v33 }
  0x34   :  { %v188_v38 = vsel %vm178_vm10, %v174_v30, 1326507024  ;;  %v182_v39 = vsel %vm176_vm7, %v179_v31, %v181_v36  ;;  %v186_v41 = vsel %vm176_vm7, %v183_v27, %v185_v37  ;;  %v95_v63 = vadd.s32 %v397_v13, %v394_v12 }
  0x35   :  { %v189_v42 = vsel %vm177_vm9, %v171_v29, %v188_v38  ;;  %v100_v43 = vadd.s32 536870912, %v99_v35  ;;  %v415_v45 = vmul.u32.u64.low %v382_v28, %v186_v41  ;;  %v416_v46 = vmul.u32.u64.high %v382_v28, %v186_v41, %v415_v45 }
  0x36   :  { %v190_v44 = vsel %vm176_vm7, %v187_v34, %v189_v42  ;;  %v198_v50 = vmul.u32 %v382_v28, %v182_v39  ;;  %vm131_vm5 = vweird.f32 %v368_v6  ;;  %vm235_vm9 = vweird.f32 %v370_v7 }
  0x37   :  { %v419_v47 = vmul.u32.u64.low %v382_v28, %v190_v44  ;;  %v420_v48 = vmul.u32.u64.high %v382_v28, %v190_v44, %v419_v47  ;;  %v101_v49 = vshrl.u32 %v100_v43, 30  ;;  %v201_v52 = vadd.s32 1, %v416_v46 }
  0x39   :  { %v102_v51 = vshll.u32 %v101_v49, 30  ;;  %vm200_vm11 = vc.u32 %v420_v48, %v415_v45  ;;  %v199_v19 = vadd.s32 %v415_v45, %v420_v48  ;;  %v125_v24 = vsub.s32 4, %v101_v49 }
  0x3a   :  { %v202_v40 = vsel %vm200_vm11, %v201_v52, %v416_v46 }
  0x3b   :  { %v103_v53 = vsub.s32 %v99_v35, %v102_v51  ;;  %v203_v54 = vadd.s32 %v202_v40, %v198_v50  ;;  %v126_v33 = vsel %vm41_vm14, %v125_v24, %v101_v49 }
  0x3c   :  { %v128_v8 = vsel %vm431_vm15, 0, %v126_v33 }
  0x3d   :  { %v105_v55 = vsub.s32 0, %v103_v53  ;;  %v204_v56 = vadd.s32 536870912, %v203_v54  ;;  %v132_v41 = vadd.s32 3, %v128_v8 }
  0x3f   :  { %v268_v57 = vmin.u32 %v105_v55, %v103_v53  ;;  %v205_v58 = vshrl.u32 %v204_v56, 30  ;;  %v133_v46 = vand.u32 3, %v132_v41 }
  0x41   :  { %v107_v59 = vclz %v268_v57  ;;  %v206_v60 = vshll.u32 %v205_v58, 30  ;;  %v229_v39 = vsub.s32 4, %v205_v58  ;;  %vm138_vm2 = vcmp.eq.s32.totalorder %v133_v46, 2 }
  0x42   :  { %vm135_vm3 = vcmp.eq.s32.totalorder %v133_v46, 0  ;;  %vm134_vm4 = vcmp.lt.s32.totalorder %v133_v46, 2 }
  0x43   :  { %v269_v61 = vadd.s32 4294967294, %v107_v59  ;;  %v207_v62 = vsub.s32 %v203_v54, %v206_v60  ;;  %v230_v44 = vsel %vm145_vm0, %v229_v39, %v205_v58 }
  0x44   :  { %v232_v47 = vsel %vm144_vm1, 0, %v230_v44 }
  0x45   :  { %vm270_vm12 = vcmp.lt.s32.totalorder %v269_v61, 0  ;;  %v209_v0 = vsub.s32 0, %v207_v62  ;;  %v236_v51 = vadd.s32 3, %v232_v47 }
  0x46   :  { %v110_v28 = vsel %vm270_vm12, 0, %v269_v61 }
  0x47   :  { %v111_v1 = vsub.s32 32, %v110_v28  ;;  %v112_v2 = vshll.u32 %v103_v53, %v110_v28  ;;  %v115_v3 = vsub.s32 4294967266, %v110_v28  ;;  %v272_v4 = vmin.u32 %v209_v0, %v207_v62 }
  0x48   :  { %v237_v54 = vand.u32 3, %v236_v51 }
  0x49   :  { %v113_v5 = vshrl.u32 %v95_v63, %v111_v1  ;;  %v116_v9 = vadd.s32 127, %v115_v3  ;;  %v211_v11 = vclz %v272_v4 }
  0x4a   :  { %vm242_vm6 = vcmp.eq.s32.totalorder %v237_v54, 2  ;;  %vm239_vm7 = vcmp.eq.s32.totalorder %v237_v54, 0  ;;  %vm238_vm8 = vcmp.lt.s32.totalorder %v237_v54, 2 }
  0x4b   :  { %v114_v14 = vor.u32 %v113_v5, %v112_v2  ;;  %v117_v15 = vshll.u32 %v116_v9, 23  ;;  %v273_v16 = vadd.s32 4294967294, %v211_v11 }
  0x4d   :  { %v118_v17 = vor.u32 4788187, %v117_v15  ;;  %v121_v18 = vcvt.s32.f32 %v114_v14  ;;  %vm274_vm13 = vcmp.lt.s32.totalorder %v273_v16, 0 }
  0x4e   :  { %v214_v12 = vsel %vm274_vm13, 0, %v273_v16 }
  0x4f   :  { %v119_v20 = vand.u32 2147483647, %v118_v17  ;;  %v215_v13 = vsub.s32 32, %v214_v12  ;;  %v216_v21 = vshll.u32 %v207_v62, %v214_v12  ;;  %v219_v22 = vsub.s32 4294967266, %v214_v12 }
  0x51   :  { %v122_v23 = vmul.f32 %v121_v18, %v119_v20  ;;  %v217_v25 = vshrl.u32 %v199_v19, %v215_v13  ;;  %v220_v29 = vadd.s32 127, %v219_v22 }
  0x53   :  { %v123_v31 = vxor.u32 2147483648, %v122_v23  ;;  %v218_v27 = vor.u32 %v217_v25, %v216_v21  ;;  %v221_v32 = vshll.u32 %v220_v29, 23 }
  0x55   :  { %v124_v26 = vsel %vm41_vm14, %v123_v31, %v122_v23  ;;  %v222_v35 = vor.u32 4788187, %v221_v32  ;;  %v225_v36 = vcvt.s32.f32 %v218_v27 }
  0x56   :  { %v127_v34 = vsel %vm431_vm15, %v368_v6, %v124_v26 }
  0x57   :  { %293 = vcosq.f32 %v127_v34  ;;  %v223_v37 = vand.u32 2147483647, %v222_v35 }
  0x58   :  { %295 = vsinq.f32 %v127_v34 }
  0x59   :  { %v226_v38 = vmul.f32 %v225_v36, %v223_v37 }
  0x5b   :  { %v227_v42 = vxor.u32 2147483648, %v226_v38 }
  0x5d   :  { %v228_v43 = vsel %vm145_vm0, %v227_v42, %v226_v38 }
  0x5e   :  { %v231_v45 = vsel %vm144_vm1, %v370_v7, %v228_v43 }
  0x5f   :  { %297 = vcosq.f32 %v231_v45 }
  0x60   :  { %299 = vsinq.f32 %v231_v45 }
  0x64   :  { %v294_v48 = vpop.eup %293 }
  0x65   :  { %v296_v49 = vpop.eup %295  ;;  %v139_v50 = vxor.u32 2147483648, %v294_v48 }
  0x66   :  { %v136_v52 = vxor.u32 2147483648, %v296_v49 }
  0x67   :  { %v140_v10 = vsel %vm138_vm2, %v139_v50, %v296_v49 }
  0x68   :  { %v137_v53 = vsel %vm135_vm3, %v294_v48, %v136_v52 }
  0x69   :  { %v141_v40 = vsel %vm134_vm4, %v137_v53, %v140_v10 }
  0x6a   :  { %v142_v55 = vsel %vm131_vm5, nan, %v141_v40 }
  0x6b   :  { %247 = vst [vmem:[#allocation5] sm:$0xff] %v142_v55 }
  0x6c   :  { %v298_v56 = vpop.eup %297 }
  0x6d   :  { %v300_v57 = vpop.eup %299  ;;  %v243_v58 = vxor.u32 2147483648, %v298_v56 }
  0x6e   :  { %v240_v59 = vxor.u32 2147483648, %v300_v57 }
  0x6f   :  { %v244_v60 = vsel %vm242_vm6, %v243_v58, %v300_v57 }
  0x70   :  { %v241_v61 = vsel %vm239_vm7, %v298_v56, %v240_v59 }
  0x71   :  { %v245_v6 = vsel %vm238_vm8, %v241_v61, %v244_v60 }
  0x72   :  { %v246_v62 = vsel %vm235_vm9, nan, %v245_v6 }
  0x73   :  { %248 = vst [vmem:[#allocation5 + $0x8] sm:$0xff] %v246_v62 }
  0x74   :  { %332 = shalt.err (!%p329_p9)
}
  0x75   :  { %s353_s14 = smov 128   ;;  %s354_s15 = smov 8  }
  0x76   :  { %260 = dma.vmem_to_hbm [thread:$0]  %s255_s12, 256, %s450_s1, [#allocation4], %s353_s14, %s353_s14, %s354_s15  }
  0x77   :  { %343 = dma.done.wait [#allocation4], 256  }
  0x78   :  { %344 = vsyncadd [#allocation4], 4294967040 }
  0x79   :  { %264 = vsyncpa [#allocation3], 1 }
  0x7a   :  { %265 = vsyncpa [#allocation4], 1 }

</bundles_post_ra>
